<compile_context>
chip_gen: v5e
topology: v5e:2x2
jax: 0.10.0
libtpu: 0.0.40
codegen_flags: <defaults>
</compile_context>

<pallas_src>
import jax
import jax.numpy as jnp
from jax.experimental import pallas as pl
from jax.experimental.pallas import tpu as pltpu


def _downsample_kernel(x_ref, w1_ref, w2_ref, o_ref):
    # x_ref : (2, tm, E) -- x_ref[0] = tokens t (first half), x_ref[1] = tokens t + T.
    # w1_ref, w2_ref : (E, E) resident weight tiles.   o_ref : (tm, E).
    acc = jnp.dot(x_ref[0], w1_ref[...], preferred_element_type=jnp.float32)
    acc = acc + jnp.dot(x_ref[1], w2_ref[...], preferred_element_type=jnp.float32)
    o_ref[...] = acc.astype(o_ref.dtype)


def _pick_tile_rows(T: int, E: int, itemsize: int) -> int:
    """Pick the row-tile tm so that resident weights + double-buffered
    activation/output tiles fit a 32 MiB VMEM budget (safe on all generations,
    including v7x's 64 MiB physical VMEM)."""
    budget = 32 * 1024 * 1024
    weight_bytes = 2 * E * E * itemsize            # two (E,E) tiles, single-buffered (constant index)
    per_row = (2 + 1) * 2 * E * itemsize           # (x-pair in + out), each double-buffered
    avail = max(budget - weight_bytes, 8 * per_row)
    tm = min(avail // per_row, 1024)
    sublane = max(8, 32 // max(itemsize, 1))       # 8 for fp32, 16 for bf16, 32 for int8/fp8
    tm = max(sublane * (tm // sublane), sublane)
    return T if T <= tm else int(tm)


def split_downsample_weight(weight: jax.Array):
    """Split the (E, 2E) nn.Linear weight into the two (E, E) operands the
    kernel consumes.  Call ONCE at parameter-load time, not per forward."""
    E = weight.shape[0]
    assert weight.shape == (E, 2 * E)
    w1 = weight[:, :E].T   # acts on tokens t        (first half of the pair)
    w2 = weight[:, E:].T   # acts on tokens t + T    (second half of the pair)
    return w1, w2


@jax.jit
def linear_downsample_pallas(x: jax.Array, w1: jax.Array, w2: jax.Array) -> jax.Array:
    """Fused LinearDownsample.forward: x (B, S, E) -> (B, S//2, E)."""
    B, S, E = x.shape
    assert S % 2 == 0, "sequence length must be even"
    T = S // 2
    assert w1.shape == (E, E) and w2.shape == (E, E)

    itemsize = jnp.dtype(x.dtype).itemsize
    tm = _pick_tile_rows(T, E, itemsize)
    grid = (B, pl.cdiv(T, tm))

    # Free reshape (metadata only): '(n t)' => halves of the sequence axis.
    x4 = x.reshape(B, 2, T, E)

    # Advisory cost + explicit VMEM limit (defaults are far below physical).
    flops = 2 * B * T * E * (2 * E)
    bytes_accessed = (x.size + w1.size + w2.size + B * T * E) * itemsize
    vmem_est = (2 * E * E + 6 * tm * E) * itemsize
    vmem_limit = int(min(max(2 * vmem_est, 32 * 1024 * 1024), 48 * 1024 * 1024))

    return pl.pallas_call(
        _downsample_kernel,
        out_shape=jax.ShapeDtypeStruct((B, T, E), x.dtype),
        grid_spec=pltpu.PrefetchScalarGridSpec(
            num_scalar_prefetch=0,
            grid=grid,
            in_specs=[
                # One (2, tm, E) tile of the paired halves per grid step.
                pl.BlockSpec((None, 2, tm, E), lambda b, mi: (b, 0, mi, 0)),
                # Weights: constant block index -> resident in VMEM.
                pl.BlockSpec((E, E), lambda b, mi: (0, 0)),
                pl.BlockSpec((E, E), lambda b, mi: (0, 0)),
            ],
            out_specs=pl.BlockSpec((None, tm, E), lambda b, mi: (b, mi, 0)),
        ),
        compiler_params=pltpu.CompilerParams(
            dimension_semantics=("parallel", "parallel"),
            vmem_limit_bytes=vmem_limit,
        ),
        cost_estimate=pl.CostEstimate(
            flops=flops, transcendentals=0, bytes_accessed=bytes_accessed
        ),
    )(x4, w1, w2)


def linear_downsample(x: jax.Array, weight: jax.Array) -> jax.Array:
    """Convenience wrapper (splits the weight per call).  In a real model,
    hoist split_downsample_weight() out of the hot loop."""
    w1, w2 = split_downsample_weight(weight)
    return linear_downsample_pallas(x, w1, w2)


def _reference(x: jax.Array, weight: jax.Array) -> jax.Array:
    B, S, E = x.shape
    T = S // 2
    # einops '... (n t) e -> ... t (n e)', n=2: concat(x[:, t], x[:, T + t]).
    x_pairs = jnp.concatenate([x[:, :T, :], x[:, T:, :]], axis=-1)
    return jnp.einsum("btk,ok->bto", x_pairs, weight)


if __name__ == "__main__":
    key = jax.random.PRNGKey(0)
    k_x, k_w = jax.random.split(key)

    B, S, E = 2, 8, 32  # batch=2, seq=8 (-> 4 after downsample), embedding=32

    x = jax.random.normal(k_x, (B, S, E), dtype=jnp.float32)
    # Deterministic weight mimicking nn.Linear's uniform(-1/sqrt(2E), 1/sqrt(2E)).
    bound = 1.0 / jnp.sqrt(2.0 * E)
    weight = jax.random.uniform(
        k_w, (E, 2 * E), dtype=jnp.float32, minval=-bound, maxval=bound
    )

    w1, w2 = split_downsample_weight(weight)   # hoisted out of the hot path
    out = linear_downsample_pallas(x, w1, w2)
    out = jax.block_until_ready(out)

    ref = _reference(x, weight)
    assert out.shape == (B, S // 2, E)
    assert jnp.allclose(out, ref, atol=1e-5, rtol=1e-5)

    print("KERNEL_OK")
</pallas_src>

<mosaic_0001>
module attributes {stable_mosaic.version = 11 : i64} {
  func.func @_downsample_kernel(%arg0: i32, %arg1: i32, %arg2: memref<1x2x4x32xf32, #tpu.memory_space<vmem>>, %arg3: memref<32x32xf32, #tpu.memory_space<vmem>>, %arg4: memref<32x32xf32, #tpu.memory_space<vmem>>, %arg5: memref<1x4x32xf32, #tpu.memory_space<vmem>>) attributes {dimension_semantics = [#tpu.dimension_semantics<parallel>, #tpu.dimension_semantics<parallel>], iteration_bounds = array<i64: 2, 1>, scalar_prefetch = 0 : i64, scratch_operands = 0 : i64, tpu.core_type = #tpu.core_type<tc>, window_params = [{transform_indices = @transform_0, window_bounds = array<i64: 1, 2, 4, 32>}, {pipeline_mode = #tpu.pipeline_mode<synchronous>, transform_indices = @transform_1, window_bounds = array<i64: 32, 32>}, {pipeline_mode = #tpu.pipeline_mode<synchronous>, transform_indices = @transform_2, window_bounds = array<i64: 32, 32>}, {transform_indices = @transform_3, window_bounds = array<i64: 1, 4, 32>}]} {
    %c0 = arith.constant 0 : index
    %c0_0 = arith.constant 0 : index
    %c0_1 = arith.constant 0 : index
    %c0_2 = arith.constant 0 : index
    %0 = vector.load %arg2[%c0, %c0_0, %c0_1, %c0_2] : memref<1x2x4x32xf32, #tpu.memory_space<vmem>>, vector<1x1x4x32xf32>
    %1 = vector.shape_cast %0 : vector<1x1x4x32xf32> to vector<4x32xf32>
    %c0_3 = arith.constant 0 : index
    %c0_4 = arith.constant 0 : index
    %2 = vector.load %arg3[%c0_3, %c0_4] : memref<32x32xf32, #tpu.memory_space<vmem>>, vector<32x32xf32>
    %cst = arith.constant dense<0.000000e+00> : vector<4x32xf32>
    %3 = tpu.matmul %1, %2, %cst {dimension_numbers = #tpu.dot_dimension_numbers<[1], [0], [0], [1], [0, 0, 1, 1], [], []>} : vector<4x32xf32>, vector<32x32xf32>, vector<4x32xf32> -> vector<4x32xf32>
    %c0_5 = arith.constant 0 : index
    %c1 = arith.constant 1 : index
    %c0_6 = arith.constant 0 : index
    %c0_7 = arith.constant 0 : index
    %4 = vector.load %arg2[%c0_5, %c1, %c0_6, %c0_7] : memref<1x2x4x32xf32, #tpu.memory_space<vmem>>, vector<1x1x4x32xf32>
    %5 = vector.shape_cast %4 : vector<1x1x4x32xf32> to vector<4x32xf32>
    %c0_8 = arith.constant 0 : index
    %c0_9 = arith.constant 0 : index
    %6 = vector.load %arg4[%c0_8, %c0_9] : memref<32x32xf32, #tpu.memory_space<vmem>>, vector<32x32xf32>
    %cst_10 = arith.constant dense<0.000000e+00> : vector<4x32xf32>
    %7 = tpu.matmul %5, %6, %cst_10 {dimension_numbers = #tpu.dot_dimension_numbers<[1], [0], [0], [1], [0, 0, 1, 1], [], []>} : vector<4x32xf32>, vector<32x32xf32>, vector<4x32xf32> -> vector<4x32xf32>
    %8 = arith.addf %3, %7 : vector<4x32xf32>
    %c0_11 = arith.constant 0 : index
    %c0_12 = arith.constant 0 : index
    %c0_13 = arith.constant 0 : index
    %9 = vector.load %arg5[%c0_11, %c0_12, %c0_13] : memref<1x4x32xf32, #tpu.memory_space<vmem>>, vector<1x4x32xf32>
    %10 = vector.shape_cast %9 : vector<1x4x32xf32> to vector<4x32xf32>
    %11 = vector.shape_cast %8 : vector<4x32xf32> to vector<1x4x32xf32>
    tpu.vector_store %arg5[%c0_11, %c0_12, %c0_13], %11 {strides = array<i32>} : memref<1x4x32xf32, #tpu.memory_space<vmem>>, vector<1x4x32xf32>,
    return
  }
  func.func @transform_0(%arg0: i32, %arg1: i32) -> (i32, i32, i32, i32) {
    %c0_i32 = arith.constant 0 : i32
    %c0_i32_0 = arith.constant 0 : i32
    %c0_i32_1 = arith.constant 0 : i32
    return %arg0, %c0_i32, %arg1, %c0_i32_0 : i32, i32, i32, i32
  }
  func.func @transform_1(%arg0: i32, %arg1: i32) -> (i32, i32) {
    %c0_i32 = arith.constant 0 : i32
    %c0_i32_0 = arith.constant 0 : i32
    %c0_i32_1 = arith.constant 0 : i32
    return %c0_i32, %c0_i32_0 : i32, i32
  }
  func.func @transform_2(%arg0: i32, %arg1: i32) -> (i32, i32) {
    %c0_i32 = arith.constant 0 : i32
    %c0_i32_0 = arith.constant 0 : i32
    %c0_i32_1 = arith.constant 0 : i32
    return %c0_i32, %c0_i32_0 : i32, i32
  }
  func.func @transform_3(%arg0: i32, %arg1: i32) -> (i32, i32, i32) {
    %c0_i32 = arith.constant 0 : i32
    %c0_i32_0 = arith.constant 0 : i32
    return %arg0, %arg1, %c0_i32 : i32, i32, i32
  }
}

</mosaic_0001>

<bundles_post_ra>
// kernel: linear_downsample_pallas.1
= control target key start
LH: loop header
LB: loop body
LE: loop exit
PB: predicated region body
PF: predicated region fallthrough
CT: control target
= control target key end

     0   :  { %s886_s0 = inlined_call_operand.hbm [shape: f32[2,2,4,32], index: 0, kind: input, shape index: {}]   ;;  %s887_s1 = inlined_call_operand.hbm [shape: f32[32,32], index: 1, kind: input, shape index: {}]   ;;  %s888_s2 = inlined_call_operand.hbm [shape: f32[32,32], index: 2, kind: input, shape index: {}]   ;;  %s889_s3 = inlined_call_operand.hbm [shape: f32[2,4,32], index: 3, kind: output, shape index: {}]  }
   0x1   :  { %890 = sst [smem:[#allocation12_spill]] %s887_s1 }
   0x2   :  { %8 = vsyncpa [#allocation3], 0 }
   0x3   :  { %10 = vsyncpa [#allocation3 + $0x1], 0 }
   0x4   :  { %11 = vsyncpa [#allocation6], 0 }
   0x5   :  { %12 = vsyncpa [#allocation4], 0 }
   0x6   :  { %14 = vsyncpa [#allocation4 + $0x1], 0  ;;  %s731_s12 = smov 0   ;;  %s733_s13 = smov 0  }
   0x7   :  { %s735_s14 = smov 0   ;;  %s737_s15 = smov 0  }
   0x8   :  { %s739_s16 = smov 0   ;;  %s741_s17 = smov 0  }
   0x9 LB: > { %s418_s18 = sadd.s32 4294967295, %s703_s17   ;;  %s419_s19 = sadd.s32 4294967294, %s703_s17   ;;  %s703_s17 = sphi %s741_s17, %s20_s17   ;;  %s699_s16 = sphi %s739_s16, %s903_s16   ;;  %s695_s15 = sphi %s737_s15, %s902_s15   ;;  %s691_s14 = sphi %s735_s14, %s901_s14   ;;  %s687_s13 = sphi %s733_s13, %s900_s13   ;;  %s683_s12 = sphi %s731_s12, %s899_s12  }
   0xa   : > { %p54_p0 = scmp.ne.s32.totalorder %s687_s13, %s683_s12  ;;  %p765_p1 = scmp.eq.s32.totalorder %s418_s18, 0 }
   0xb   : > { %p769_p2 = scmp.eq.s32.totalorder %s418_s18, 1  ;;  %p128_p3 = scmp.eq.s32.totalorder %s419_s19, 1 }
   0xc   : > { %p775_p4 = por %p765_p1, %p54_p0  ;;  %p420_p5 = scmp.ge.s32.totalorder %s703_s17, 1 }
   0xd   : > { %p780_p6 = por %p128_p3, %p54_p0  ;;  %p135_p7 = scmp.lt.s32.totalorder %s703_s17, 3 }
   0xe   : > { %s895_s1 = sld [smem:[#allocation12_spill]]  ;;  %s705_s28 = smov [#allocation5]  }
   0xf   : > { %p788_p8 = pnand %p420_p5, %p135_p7  ;;  %s148_s29 = sshll.u32 %s705_s28, 4  ;;  %s149_s29 = int_to_ptr.vmem [resolvable:$true] %s148_s29 }
  0x10   : > { %p423_p11 = scmp.ge.s32.totalorder %s703_s17, 2  ;;  %s160_s5 = sshll.u32 %s888_s2, 4  ;;  %s161_s5 = int_to_ptr.hbm [resolvable:$true] %s160_s5 }
  0x11   : > { %p452_p9 = pneg %p788_p8  ;;  %s706_s6 = smov 128  }
  0x12   : > { %s707_s7 = smov 8   ;;  %s708_s8 = smov [#allocation7]  }
  0x13   : > { %p453_p10 = pnand %p452_p9, %p765_p1  ;;  %s162_s9 = sshll.u32 %s708_s8, 4  ;;  %s163_s9 = int_to_ptr.vmem [resolvable:$true] %s162_s9 }
  0x14   : > { %s146_s26 = sshll.u32 %s895_s1, 4  ;;  %s32_s10 = sadd.s32 1, %s699_s16  ;;  %s147_s26 = int_to_ptr.hbm [resolvable:$true] %s146_s26 }
  0x15   : > { %455 = dma.hbm_to_vmem [thread:$0]  (!%p453_p10), %s147_s26, 512, %s149_s29, [#allocation6], %s706_s6, %s706_s6, %s707_s7  }
  0x16   : > { %458 = dma.hbm_to_vmem [thread:$0]  (!%p453_p10), %s161_s5, 512, %s163_s9, [#allocation6], %s706_s6, %s706_s6, %s707_s7  }
  0x17   : > { %s41_s11 = sadd.s32 1, %s691_s14  ;;  %p34_p12 = scmp.ge.s32.totalorder %s32_s10, 2 }
  0x18   : > { %p48_p13 = scmp.ne.s32.totalorder %s691_s14, %s687_s13  ;;  %p49_p0 = scmp.eq.s32.totalorder %s703_s17, 0 }
  0x19   : > { %p469_p3 = scmp.lt.s32.totalorder %s703_s17, 2  ;;  %s905_s10 = smov (%p34_p12, %s32_s10), 0 }
  0x1a   : > { %p808_p5 = por %p49_p0, %p48_p13  ;;  %p814_p7 = por %p769_p2, %p48_p13 }
  0x1b   : > { %s36_s24 = ssub.s32 %s699_s16, %s905_s10  ;;  %s176_s25 = sand.u32 1, %s691_s14  }
  0x1c   : > { %p39_p9 = scmp.eq.s32.totalorder %s36_s24, 0  ;;  %s424_s26 = sshll.u32 %s176_s25, 3 }
  0x1d   : > { %s439_s28 = sshll.u32 %s699_s16, 3  ;;  %s180_s7 = scalar_lea.vmem [#allocation2], %s424_s26 }
  0x1e   : > { %s823_s29 = scalar_select %p39_p9, %s691_s14, %s41_s11  }
  0x1f   : > { %s186_s5 = scalar_lea.hbm %s886_s0, %s439_s28  ;;  %s189_s8 = sshll.u32 %s180_s7, 4  ;;  %s190_s8 = int_to_ptr.vmem [resolvable:$true] %s189_s8 }
  0x20   : > { %s187_s6 = sshll.u32 %s186_s5, 4  ;;  %p460_p2 = pnand %p469_p3, %p808_p5  ;;  %s188_s6 = int_to_ptr.hbm [resolvable:$true] %s187_s6 }
  0x21   : > { %s177_s21 = scalar_lea.sflag [#allocation3], %s176_s25  ;;  %s709_s9 = smov 64  }
  0x22   : > { %s710_s1 = smov 4   ;;  %201 = sbr.rel (%p788_p8) target bundleno = 182 (0xb6), region = 32 }
  0x23   : > { %462 = dma.hbm_to_vmem [thread:$0]  (!%p460_p2), %s188_s6, 128, %s190_s8, %s177_s21, %s709_s9, %s709_s9, %s710_s1  }
  0x24   : > { %s835_s11 = sand.u32 (!%p788_p8), 1, %s687_s13  }
  0x25   : > { %s428_s24 = sshll.u32 (!%p788_p8), %s835_s11, 3  ;;  %s204_s26 = scalar_lea.sflag (!%p788_p8), [#allocation3], %s835_s11 }
  0x26   : > { %s207_s28 = scalar_lea.vmem (!%p788_p8), [#allocation2], %s428_s24 }
  0x27   : > { %670 = dma.done.wait (%p775_p4), %s204_s26, 128  }
  0x28   : > { %672 = vsyncadd (%p775_p4), %s204_s26, 4294967168 }
  0x29   : > { %674 = dma.done.wait (%p765_p1), [#allocation6], 1024  }
  0x2a   : > { %676 = vsyncadd (%p765_p1), [#allocation6], 4294966272  ;;  %v251_v0 = vld [vmem:[#allocation7 + $0x18] sm:$0xff]  ;;  %v250_v2 = vld [vmem:[#allocation7 + $0x10] sm:$0xff]  ;;  %vm252_vm0 = vcmask 261120   ;;  %s431_s1 = sshll.u32 %s835_s11, 2 }
  0x2b   : > { %v245_v1 = vld [vmem:[#allocation5 + $0x18] sm:$0xff]  ;;  %268 = vmatpush.msra.mxu0 %v251_v0  ;;  %v244_v3 = vld [vmem:[#allocation5 + $0x10] sm:$0xff]  ;;  %v249_v4 = vld [vmem:[#allocation7 + $0x8] sm:$0xff]  ;;  %s436_s20 = sshll.u32 %s695_s15, 2  ;;  %s240_s25 = scalar_lea.vmem [#allocation8], %s431_s1  ;;  %vm299_vm1 = vcmask 257024  }
  0x2c   : > { %291 = vmatpush.msra.mxu1 %v245_v1  ;;  %v243_v5 = vld [vmem:[#allocation5 + $0x8] sm:$0xff]  ;;  %v248_v6 = vld [vmem:[#allocation7] sm:$0xff]  ;;  %v432_v8 = vld [vmem:[%s207_s28 + $0x4] sm:$0xf]  ;;  %s313_s18 = scalar_lea.hbm %s889_s3, %s436_s20  ;;  %s315_s30 = sshll.u32 %s240_s25, 4  ;;  %s316_s30 = int_to_ptr.vmem [resolvable:$true] %s315_s30 }
  0x2d   : > { %269 = vmatpush.msra.mxu0 %v250_v2  ;;  %v242_v7 = vld [vmem:[#allocation5] sm:$0xff]  ;;  %v241_v9 = vld [vmem:[%s207_s28] sm:$0xf]  ;;  %s317_s4 = sshll.u32 %s313_s18, 4  ;;  %s302_s5 = scalar_lea.sflag [#allocation4], %s835_s11  ;;  %s318_s4 = int_to_ptr.hbm [resolvable:$true] %s317_s4 }
  0x2e   : > { %292 = vmatpush.msra.mxu1 %v244_v3  ;;  %s631_s6 = sshra.s32 %s318_s4, 4  ;;  %s637_s21 = scalar_lea.hbm %s889_s3, 8  ;;  %s632_s6 = int_to_ptr.hbm [resolvable:$true] %s631_s6 }
  0x2f   : > { %270 = vmatpush.msra.mxu0 %v249_v4  ;;  %s633_s7 = scalar_lea.hbm %s632_s6, 4  ;;  %p638_p10 = scmp.lt.s32.totalorder %s632_s6, %s889_s3 }
  0x30   : > { %293 = vmatpush.msra.mxu1 %v243_v5  ;;  %p634_p1 = scmp.ne.s32.totalorder %s632_s6, %s633_s7  ;;  %p639_p12 = scmp.lt.s32.totalorder %s637_s21, %s633_s7 }
  0x31   : > { %271 = vmatpush.msra.mxu0 %v248_v6 }
  0x32   : > { %294 = vmatpush.msra.mxu1 %v242_v7  ;;  %433 = vmatmul.msk.f32.vlgmr.msra.gmra.mxu0 %vm252_vm0, %v432_v8  ;;  %p635_p4 = pnand %p634_p1, %p814_p7  ;;  %p640_p13 = por %p639_p12, %p638_p10 }
  0x33   : > { %434 = vmatmul.msk.f32.vlgmr.msra.gmra.mxu1 %vm252_vm0, %v241_v9 }
  0x34   : > { %p636_p8 = pneg %p635_p4 }
  0x36   : > { %p641_p0 = pnand %p640_p13, %p636_p8 }
  0xaf   : > { %v273_v10 = vpop.f32.mrf.mxu0 }
  0xb0   : > { %v296_v11 = vpop.f32.mrf.mxu1 }
  0xb1   : > { %v297_v12 = vadd.f32 %v296_v11, %v273_v10 }
  0xb3   : > { %300 = vst.msk [vmem:[%s240_s25] sm:$0xf] %vm299_vm1, %v297_v12 }
  0xb4   : > { %644 = shalt.err (!%p641_p0)
}
  0xb5   : > { %450 = dma.vmem_to_hbm [thread:$0]  (%p814_p7), %s316_s30, 64, %s318_s4, %s302_s5  }
  0xb6 PF: > { %s329_s11 = sand.u32 1, %s683_s12   ;;  %p464_p3 = pnand %p423_p11, %p780_p6 }
  0xb7   : > { %s330_s26 = scalar_lea.sflag [#allocation4], %s329_s11 }
  0xb8   : > { %p465_p5 = pneg %p464_p3 }
  0xba   : > { %678 = dma.done.wait (%p465_p5), %s330_s26, 64  }
  0xbb   : > { %680 = vsyncadd (%p465_p5), %s330_s26, 4294967232  ;;  %s20_s17 = sadd.s32 1, %s703_s17   ;;  %s899_s12 = smov %s687_s13 }
  0xbc   : > { %p17_p9 = scmp.ge.s32.totalorder %s20_s17, 4   ;;  %s900_s13 = smov %s691_s14 }
  0xbd   : > { %s901_s14 = smov %s823_s29  ;;  %s902_s15 = smov %s699_s16 }
  0xbe   : > { %s903_s16 = smov %s905_s10  ;;  %19 = sbr.rel (!%p17_p9) target bundleno = 9 (0x9), region = 86 }
  0xc3   :  { %336 = vsyncpa [#allocation3], 1 }
  0xc4   :  { %338 = vsyncpa [#allocation3 + $0x1], 1 }
  0xc5   :  { %339 = vsyncpa [#allocation6], 1 }
  0xc6   :  { %340 = vsyncpa [#allocation4], 1 }
  0xc7   :  { %342 = vsyncpa [#allocation4 + $0x1], 1 }

</bundles_post_ra>
